<compile_context>
chip_gen: v6e
topology: v6e:2x2x1
jax: 0.10.0
libtpu: 0.0.40
codegen_flags: <defaults>
</compile_context>

<pallas_src>
import jax
import jax.numpy as jnp
from jax.experimental import pallas as pl
from jax.experimental.pallas import tpu as pltpu


def _round_up(x, m):
    return ((x + m - 1) // m) * m


def _make_esmm_kernel(has_dense):
    if has_dense:
        def kernel(emb_ref, dense_ref, w1e_ref, w1d_ref, b1_ref, w2_ref, b2_ref, out_ref):
            # Fused layer 1 for both heads; the fc_input concat is realized as
            # the sum of two MXU matmuls (bf16 in, f32 accumulate).
            h = jnp.dot(emb_ref[...], w1e_ref[...],
                        preferred_element_type=jnp.float32)               # [TB, 2H]
            h = h + jnp.dot(dense_ref[...].astype(jnp.bfloat16), w1d_ref[...],
                            preferred_element_type=jnp.float32)
            h = jnp.maximum(h + b1_ref[...], 0.0)                         # bias + ReLU (f32)
            # Layer 2: block-diagonal [2H, 2] matmul -> lane-packed logits.
            logits = jnp.dot(h.astype(jnp.bfloat16), w2_ref[...],
                             preferred_element_type=jnp.float32) + b2_ref[...]
            out_ref[...] = jax.nn.sigmoid(logits)                         # [TB, 2]
    else:
        def kernel(emb_ref, w1e_ref, b1_ref, w2_ref, b2_ref, out_ref):
            h = jnp.dot(emb_ref[...], w1e_ref[...],
                        preferred_element_type=jnp.float32)
            h = jnp.maximum(h + b1_ref[...], 0.0)
            logits = jnp.dot(h.astype(jnp.bfloat16), w2_ref[...],
                             preferred_element_type=jnp.float32) + b2_ref[...]
            out_ref[...] = jax.nn.sigmoid(logits)
    return kernel


def esmm_forward(cat_fea_list, dense_features, params, *, tile_b_cap=None):
    """cat_fea_list: int32 [B, cat_fea_cnt]; dense_features: f32 [B, dense_fea_dim]."""
    B = cat_fea_list.shape[0]
    H = params["w1_ctr"].shape[1]
    De = cat_fea_list.shape[1] * params["embedding"].shape[1]
    Dd = dense_features.shape[1]
    has_dense = Dd > 0
    D = De + Dd

    # Embedding gather + flatten, written straight to bf16 (one B x De bf16 HBM
    # producer).  No concat, no pad, no separate astype pass.
    emb = params["embedding"][cat_fea_list].reshape(B, De).astype(jnp.bfloat16)
    dense = dense_features.astype(jnp.float32)

    # Pack both heads.  (For production, hoist this packing out of the step fn.)
    w1p = jnp.concatenate([params["w1_ctr"], params["w1_cvr"]],
                          axis=1).astype(jnp.bfloat16)                        # [D, 2H]
    w1e = w1p[:De]                                                            # [De, 2H]
    w1d = w1p[De:] if has_dense else None                                     # [Dd, 2H]
    b1p = jnp.concatenate([params["b1_ctr"], params["b1_cvr"]], axis=1)       # [1, 2H] f32
    zH = jnp.zeros((H, 1), jnp.float32)
    w2_blk = jnp.concatenate(
        [jnp.concatenate([params["w2_ctr"], zH], axis=1),
         jnp.concatenate([zH, params["w2_cvr"]], axis=1)],
        axis=0).astype(jnp.bfloat16)                                          # [2H, 2]
    b2p = jnp.concatenate([params["b2_ctr"], params["b2_cvr"]], axis=1)       # [1, 2]  f32

    # Scoped-VMEM budget ~ half of physical VMEM (v5e/v6e: ~64 MiB, v7x: 32 MiB).
    try:
        vmem_cap = int(pltpu.get_tpu_info().vmem_capacity_bytes)
    except Exception:
        vmem_cap = 64 * 1024 * 1024
    vmem_limit = min(max(vmem_cap // 2, 32 * 1024 * 1024), 96 * 1024 * 1024)

    if tile_b_cap is None:
        tile_b_cap = 1024 if vmem_cap >= 96 * 1024 * 1024 else 512

    # v7x megacore: aim for an even number of batch tiles so both TensorCores
    # get balanced work; no effect on v5e/v6e (single TC).
    n_tiles = pl.cdiv(B, tile_b_cap)
    n_tiles += n_tiles % 2
    tile_b = max(16, _round_up(pl.cdiv(B, n_tiles), 16))

    # Shrink the tile if double-buffered activations + resident weights would
    # exceed the scoped VMEM budget (rough, lane-padded estimate).
    def _vmem_use(tb):
        lane = 128
        act = 2 * tb * _round_up(De, lane) * 2                     # emb stream (bf16)
        if has_dense:
            act += 2 * tb * _round_up(Dd, lane) * 4                # dense stream (f32)
        out_b = 2 * tb * lane * 4                                  # lane-padded out
        w = 2 * (D * _round_up(2 * H, lane) * 2                    # W1 (bf16)
                 + _round_up(2 * H, lane) * 4                      # b1
                 + _round_up(2 * H, 8) * lane * 2                  # w2 block-diag
                 + lane * 4)                                       # b2
        return act + out_b + w

    while tile_b > 16 and _vmem_use(tile_b) > vmem_limit - (2 << 20):
        tile_b = max(16, _round_up(tile_b // 2, 16))
    n_blocks = pl.cdiv(B, tile_b)

    # Advisory cost estimate for XLA's scheduler.
    cost = pl.CostEstimate(
        flops=2 * B * D * (2 * H) + 2 * B * (2 * H) * 2,
        transcendentals=2 * B,
        bytes_accessed=(B * De * 2 + B * Dd * 4 + D * 2 * H * 2
                        + 2 * H * 4 + 2 * H * 2 * 2 + 2 * 4 + B * 2 * 4),
    )

    if has_dense:
        args = (emb, dense, w1e, w1d, b1p, w2_blk, b2p)
        in_specs = [
            pl.BlockSpec((tile_b, De), lambda i: (i, 0)),      # emb: streamed per tile
            pl.BlockSpec((tile_b, Dd), lambda i: (i, 0)),      # dense: streamed per tile
            pl.BlockSpec((De, 2 * H), lambda i: (0, 0)),       # W1_emb: resident
            pl.BlockSpec((Dd, 2 * H), lambda i: (0, 0)),       # W1_dense: resident
            pl.BlockSpec((1, 2 * H), lambda i: (0, 0)),        # b1: resident
            pl.BlockSpec((2 * H, 2), lambda i: (0, 0)),        # block-diag w2: resident
            pl.BlockSpec((1, 2), lambda i: (0, 0)),            # b2: resident
        ]
    else:
        args = (emb, w1e, b1p, w2_blk, b2p)
        in_specs = [
            pl.BlockSpec((tile_b, De), lambda i: (i, 0)),
            pl.BlockSpec((De, 2 * H), lambda i: (0, 0)),
            pl.BlockSpec((1, 2 * H), lambda i: (0, 0)),
            pl.BlockSpec((2 * H, 2), lambda i: (0, 0)),
            pl.BlockSpec((1, 2), lambda i: (0, 0)),
        ]

    out = pl.pallas_call(
        _make_esmm_kernel(has_dense),
        out_shape=jax.ShapeDtypeStruct((B, 2), jnp.float32),
        grid=(n_blocks,),
        in_specs=in_specs,
        out_specs=pl.BlockSpec((tile_b, 2), lambda i: (i, 0)),  # lane-packed output
        compiler_params=pltpu.CompilerParams(
            dimension_semantics=("parallel",),                  # megacore-shard batch
            vmem_limit_bytes=int(vmem_limit),
        ),
        cost_estimate=cost,
    )(*args)

    # torch: .squeeze() on [B, 1] -> [B]
    return out[:, 0], out[:, 1]


def init_params(key, cat_fea_size, embd_dim, task_hidden_unit, cat_fea_cnt, dense_fea_dim):
    input_dim = cat_fea_cnt * embd_dim + dense_fea_dim
    ks = jax.random.split(key, 9)
    scale1 = 1.0 / jnp.sqrt(input_dim)
    scale2 = 1.0 / jnp.sqrt(task_hidden_unit)
    return {
        "embedding": jax.random.normal(ks[0], (cat_fea_size, embd_dim), jnp.float32),
        "w1_ctr": jax.random.uniform(ks[1], (input_dim, task_hidden_unit), jnp.float32, -scale1, scale1),
        "b1_ctr": jax.random.uniform(ks[2], (1, task_hidden_unit), jnp.float32, -scale1, scale1),
        "w2_ctr": jax.random.uniform(ks[3], (task_hidden_unit, 1), jnp.float32, -scale2, scale2),
        "b2_ctr": jax.random.uniform(ks[4], (1, 1), jnp.float32, -scale2, scale2),
        "w1_cvr": jax.random.uniform(ks[5], (input_dim, task_hidden_unit), jnp.float32, -scale1, scale1),
        "b1_cvr": jax.random.uniform(ks[6], (1, task_hidden_unit), jnp.float32, -scale1, scale1),
        "w2_cvr": jax.random.uniform(ks[7], (task_hidden_unit, 1), jnp.float32, -scale2, scale2),
        "b2_cvr": jax.random.uniform(ks[8], (1, 1), jnp.float32, -scale2, scale2),
    }


if __name__ == "__main__":
    # Small, deterministic configuration.
    B = 8
    cat_fea_size = 100
    embd_dim = 8
    task_hidden_unit = 32
    cat_fea_cnt = 4
    dense_fea_dim = 8

    key = jax.random.PRNGKey(0)
    kp, kc, kd = jax.random.split(key, 3)

    params = init_params(kp, cat_fea_size, embd_dim, task_hidden_unit,
                         cat_fea_cnt, dense_fea_dim)

    cat_fea_list = jax.random.randint(kc, (B, cat_fea_cnt), 0, cat_fea_size, jnp.int32)
    dense_features = jax.random.normal(kd, (B, dense_fea_dim), jnp.float32)

    forward = jax.jit(esmm_forward)
    ctr_out, cvr_out = forward(cat_fea_list, dense_features, params)
    jax.block_until_ready((ctr_out, cvr_out))

    # Pure-JAX f32 reference (bf16 layer-1/2 inputs -> slightly widened tolerance).
    emb = params["embedding"][cat_fea_list].reshape(B, -1)
    x_ref = jnp.concatenate([emb, dense_features], axis=1)

    def head(x, w1, b1, w2, b2):
        h = jnp.maximum(x @ w1 + b1, 0.0)
        return jax.nn.sigmoid(h @ w2 + b2)[:, 0]

    ctr_ref = head(x_ref, params["w1_ctr"], params["b1_ctr"], params["w2_ctr"], params["b2_ctr"])
    cvr_ref = head(x_ref, params["w1_cvr"], params["b1_cvr"], params["w2_cvr"], params["b2_cvr"])

    assert ctr_out.shape == (B,) and cvr_out.shape == (B,)
    assert jnp.allclose(ctr_out, ctr_ref, atol=2e-2), "CTR mismatch"
    assert jnp.allclose(cvr_out, cvr_ref, atol=2e-2), "CVR mismatch"

    print("KERNEL_OK")
</pallas_src>

<mosaic_0001>
module attributes {stable_mosaic.version = 11 : i64} {
  func.func @kernel(%arg0: i32, %arg1: memref<16x32xbf16, #tpu.memory_space<vmem>>, %arg2: memref<16x8xf32, #tpu.memory_space<vmem>>, %arg3: memref<32x64xbf16, #tpu.memory_space<vmem>>, %arg4: memref<8x64xbf16, #tpu.memory_space<vmem>>, %arg5: memref<1x64xf32, #tpu.memory_space<vmem>>, %arg6: memref<64x2xbf16, #tpu.memory_space<vmem>>, %arg7: memref<1x2xf32, #tpu.memory_space<vmem>>, %arg8: memref<16x2xf32, #tpu.memory_space<vmem>>) attributes {dimension_semantics = [#tpu.dimension_semantics<parallel>], iteration_bounds = array<i64: 1>, scalar_prefetch = 0 : i64, scratch_operands = 0 : i64, tpu.core_type = #tpu.core_type<tc>, window_params = [{transform_indices = @transform_0, window_bounds = array<i64: 16, 32>}, {transform_indices = @transform_1, window_bounds = array<i64: 16, 8>}, {pipeline_mode = #tpu.pipeline_mode<synchronous>, transform_indices = @transform_2, window_bounds = array<i64: 32, 64>}, {pipeline_mode = #tpu.pipeline_mode<synchronous>, transform_indices = @transform_3, window_bounds = array<i64: 8, 64>}, {pipeline_mode = #tpu.pipeline_mode<synchronous>, transform_indices = @transform_4, window_bounds = array<i64: 1, 64>}, {pipeline_mode = #tpu.pipeline_mode<synchronous>, transform_indices = @transform_5, window_bounds = array<i64: 64, 2>}, {pipeline_mode = #tpu.pipeline_mode<synchronous>, transform_indices = @transform_6, window_bounds = array<i64: 1, 2>}, {transform_indices = @transform_7, window_bounds = array<i64: 16, 2>}]} {
    %c0 = arith.constant 0 : index
    %c0_0 = arith.constant 0 : index
    %0 = vector.load %arg1[%c0, %c0_0] : memref<16x32xbf16, #tpu.memory_space<vmem>>, vector<16x32xbf16>
    %c0_1 = arith.constant 0 : index
    %c0_2 = arith.constant 0 : index
    %1 = vector.load %arg3[%c0_1, %c0_2] : memref<32x64xbf16, #tpu.memory_space<vmem>>, vector<32x64xbf16>
    %cst = arith.constant dense<0.000000e+00> : vector<16x64xf32>
    %2 = tpu.matmul %0, %1, %cst {dimension_numbers = #tpu.dot_dimension_numbers<[1], [0], [0], [1], [0, 0, 1, 1], [], []>} : vector<16x32xbf16>, vector<32x64xbf16>, vector<16x64xf32> -> vector<16x64xf32>
    %c0_3 = arith.constant 0 : index
    %c0_4 = arith.constant 0 : index
    %3 = vector.load %arg2[%c0_3, %c0_4] : memref<16x8xf32, #tpu.memory_space<vmem>>, vector<16x8xf32>
    %4 = arith.truncf %3 : vector<16x8xf32> to vector<16x8xbf16>
    %c0_5 = arith.constant 0 : index
    %c0_6 = arith.constant 0 : index
    %5 = vector.load %arg4[%c0_5, %c0_6] : memref<8x64xbf16, #tpu.memory_space<vmem>>, vector<8x64xbf16>
    %cst_7 = arith.constant dense<0.000000e+00> : vector<16x64xf32>
    %6 = tpu.matmul %4, %5, %cst_7 {dimension_numbers = #tpu.dot_dimension_numbers<[1], [0], [0], [1], [0, 0, 1, 1], [], []>} : vector<16x8xbf16>, vector<8x64xbf16>, vector<16x64xf32> -> vector<16x64xf32>
    %7 = arith.addf %2, %6 : vector<16x64xf32>
    %c0_8 = arith.constant 0 : index
    %c0_9 = arith.constant 0 : index
    %8 = vector.load %arg5[%c0_8, %c0_9] : memref<1x64xf32, #tpu.memory_space<vmem>>, vector<1x64xf32>
    %9 = vector.broadcast %8 : vector<1x64xf32> to vector<16x64xf32>
    %10 = arith.addf %7, %9 : vector<16x64xf32>
    %cst_10 = arith.constant 0.000000e+00 : f32
    %11 = vector.broadcast %cst_10 : f32 to vector<16x64xf32>
    %12 = arith.maximumf %10, %11 : vector<16x64xf32>
    %13 = arith.truncf %12 : vector<16x64xf32> to vector<16x64xbf16>
    %c0_11 = arith.constant 0 : index
    %c0_12 = arith.constant 0 : index
    %14 = vector.load %arg6[%c0_11, %c0_12] : memref<64x2xbf16, #tpu.memory_space<vmem>>, vector<64x2xbf16>
    %cst_13 = arith.constant dense<0.000000e+00> : vector<16x2xf32>
    %15 = tpu.matmul %13, %14, %cst_13 {dimension_numbers = #tpu.dot_dimension_numbers<[1], [0], [0], [1], [0, 0, 1, 1], [], []>} : vector<16x64xbf16>, vector<64x2xbf16>, vector<16x2xf32> -> vector<16x2xf32>
    %c0_14 = arith.constant 0 : index
    %c0_15 = arith.constant 0 : index
    %16 = vector.load %arg7[%c0_14, %c0_15] : memref<1x2xf32, #tpu.memory_space<vmem>>, vector<1x2xf32>
    %17 = vector.broadcast %16 : vector<1x2xf32> to vector<16x2xf32>
    %18 = arith.addf %15, %17 : vector<16x2xf32>
    %19 = arith.negf %18 : vector<16x2xf32>
    %20 = math.exp %19 : vector<16x2xf32>
    %cst_16 = arith.constant 1.000000e+00 : f32
    %21 = vector.broadcast %cst_16 : f32 to vector<16x2xf32>
    %22 = arith.addf %21, %20 : vector<16x2xf32>
    %23 = arith.divf %21, %22 : vector<16x2xf32>
    %c0_17 = arith.constant 0 : index
    %c0_18 = arith.constant 0 : index
    %24 = vector.load %arg8[%c0_17, %c0_18] : memref<16x2xf32, #tpu.memory_space<vmem>>, vector<16x2xf32>
    tpu.vector_store %arg8[%c0_17, %c0_18], %23 {strides = array<i32>} : memref<16x2xf32, #tpu.memory_space<vmem>>, vector<16x2xf32>,
    return
  }
  func.func @transform_0(%arg0: i32) -> (i32, i32) {
    %c0_i32 = arith.constant 0 : i32
    %c0_i32_0 = arith.constant 0 : i32
    return %arg0, %c0_i32 : i32, i32
  }
  func.func @transform_1(%arg0: i32) -> (i32, i32) {
    %c0_i32 = arith.constant 0 : i32
    %c0_i32_0 = arith.constant 0 : i32
    return %arg0, %c0_i32 : i32, i32
  }
  func.func @transform_2(%arg0: i32) -> (i32, i32) {
    %c0_i32 = arith.constant 0 : i32
    %c0_i32_0 = arith.constant 0 : i32
    %c0_i32_1 = arith.constant 0 : i32
    return %c0_i32, %c0_i32_0 : i32, i32
  }
  func.func @transform_3(%arg0: i32) -> (i32, i32) {
    %c0_i32 = arith.constant 0 : i32
    %c0_i32_0 = arith.constant 0 : i32
    %c0_i32_1 = arith.constant 0 : i32
    return %c0_i32, %c0_i32_0 : i32, i32
  }
  func.func @transform_4(%arg0: i32) -> (i32, i32) {
    %c0_i32 = arith.constant 0 : i32
    %c0_i32_0 = arith.constant 0 : i32
    %c0_i32_1 = arith.constant 0 : i32
    return %c0_i32, %c0_i32_0 : i32, i32
  }
  func.func @transform_5(%arg0: i32) -> (i32, i32) {
    %c0_i32 = arith.constant 0 : i32
    %c0_i32_0 = arith.constant 0 : i32
    %c0_i32_1 = arith.constant 0 : i32
    return %c0_i32, %c0_i32_0 : i32, i32
  }
  func.func @transform_6(%arg0: i32) -> (i32, i32) {
    %c0_i32 = arith.constant 0 : i32
    %c0_i32_0 = arith.constant 0 : i32
    %c0_i32_1 = arith.constant 0 : i32
    return %c0_i32, %c0_i32_0 : i32, i32
  }
  func.func @transform_7(%arg0: i32) -> (i32, i32) {
    %c0_i32 = arith.constant 0 : i32
    %c0_i32_0 = arith.constant 0 : i32
    return %arg0, %c0_i32 : i32, i32
  }
}

</mosaic_0001>

<bundles_post_ra>
// kernel: esmm_forward.1
= control target key start
LH: loop header
LB: loop body
LE: loop exit
PB: predicated region body
PF: predicated region fallthrough
CT: control target
= control target key end

     0   :  { %vm41_vm0 = vcmask 1043456   ;;  %v367_v2 = vmov 0.0   ;;  %vm368_vm1 = vmmov 0   ;;  %vm37_vm2 = vcmask 64512   ;;  %s448_s0 = inlined_call_operand.vmem [shape: bf16[8,32], index: 0, kind: input, shape index: {}]   ;;  %s449_s1 = inlined_call_operand.vmem [shape: f32[8,8], index: 1, kind: input, shape index: {}]   ;;  %s450_s2 = inlined_call_operand.vmem [shape: bf16[32,64], index: 2, kind: input, shape index: {}]   ;;  %s451_s3 = inlined_call_operand.vmem [shape: bf16[8,64], index: 3, kind: input, shape index: {}]   ;;  %s452_s4 = inlined_call_operand.vmem [shape: f32[1,64], index: 4, kind: input, shape index: {}]   ;;  %s453_s5 = inlined_call_operand.vmem [shape: bf16[64,2], index: 5, kind: input, shape index: {}]   ;;  %s454_s6 = inlined_call_operand.vmem [shape: f32[1,2], index: 6, kind: input, shape index: {}]   ;;  %s455_s7 = inlined_call_operand.vmem [shape: f32[8,2], index: 7, kind: output, shape index: {}]  }
   0x1   :  { %v36_v0 = vld [vmem:[%s451_s3] sm:$0xf]  ;;  %324 = vmatprep.subr.bf16.mxu1 %v367_v2  ;;  %326 = vmatprep.mubr.msk.bf16.mxu1 %vm368_vm1, %v367_v2  ;;  %v34_v4 = vld [vmem:[%s449_s1 + $0x8] sm:$0xff]  ;;  %vm103_vm3 = vcmask 261120   ;;  %v355_v9 = vld [vmem:[%s453_s5 + $0x18] sm:$0xff]   ;;  %vm199_vm4 = vcmask 523264  }
   0x2   :  { %v33_v1 = vld [vmem:[%s449_s1] sm:$0xff]  ;;  %v43_v3 = vsel %vm41_vm0, %v36_v0, 0  ;;  %v352_v5 = vld [vmem:[%s450_s2 + $0x8] sm:$0xff]   ;;  %338 = vmatprep.subr.bf16.mxu0 %v367_v2  ;;  %346 = vmatprep.mubr.msk.bf16.mxu0 %vm368_vm1, %v367_v2  ;;  %v356_v10 = vld [vmem:[%s453_s5 + $0x10] sm:$0xff]   ;;  %vm256_vm5 = vcmask 15360  }
   0x3   :  { %325 = vmatpush3.bf16.msra.mxu1 %v43_v3  ;;  %v35_v6 = vpack.c.bf16 %v34_v4, %v33_v1  ;;  %v353_v7 = vld [vmem:[%s450_s2] sm:$0xff]   ;;  %339 = vmatpush3.bf16.msra.mxu0 %v355_v9  ;;  %v357_v11 = vld [vmem:[%s453_s5 + $0x8] sm:$0xff]  }
   0x4   :  { %330 = vmatprep.subr.bf16.mxu1 %v367_v2  ;;  %v354_v8 = vld [vmem:[%s448_s0] sm:$0xff]   ;;  %340 = vmatprep.subr.bf16.mxu0 %v367_v2 }
   0x5   :  { %v358_v12 = vld [vmem:[%s453_s5] sm:$0xff]  }
   0x6   :  { %327 = vmatmul.mubr.msk.bf16.vlgmr.msra.gmra.mxu1 %vm37_vm2, %v35_v6  ;;  %v305_v19 = vld [vmem:[%s452_s4] ss:$0 sm:$0xff] }
   0x7   :  { %331 = vmatpush3.bf16.msra.mxu1 %v352_v5  ;;  %334 = vmatprep.mubr.msk.bf16.mxu1 %vm368_vm1, %v367_v2  ;;  %v306_v29 = vld [vmem:[%s454_s6] ss:$0 sm:$0xff] }
   0x8   :  { %332 = vmatprep.subr.bf16.mxu1 %v367_v2  ;;  %341 = vmatpush3.bf16.msra.mxu0 %v356_v10 }
   0x9   :  { %342 = vmatprep.subr.bf16.mxu0 %v367_v2 }
   0xb   :  { %333 = vmatpush3.bf16.msra.mxu1 %v353_v7 }
   0xc   :  { %343 = vmatpush3.bf16.msra.mxu0 %v357_v11 }
   0xd   :  { %344 = vmatprep.subr.bf16.mxu0 %v367_v2 }
   0xe   :  { %335 = vmatmul.mubr.msk.bf16.vlgmr.msra.gmra.mxu1 %vm103_vm3, %v354_v8 }
  0x10   :  { %345 = vmatpush3.bf16.msra.mxu0 %v358_v12 }
  0xc6   :  { %v79_v13 = vpop.f32.mrf.mxu1 }
  0xc8   :  { %v328_v14 = vpop.f32.mrf.mxu1 }
  0xca   :  { %v82_v15 = vpop.f32.mrf.mxu1 }
  0xcc   :  { %v329_v16 = vpop.f32.mrf.mxu1 }
  0xce   :  { %v141_v17 = vpop.f32.mrf.mxu1 }
  0xcf   :  { %v142_v18 = vadd.f32 %v141_v17, %v79_v13 }
  0xd0   :  { %v336_v20 = vpop.f32.mrf.mxu1 }
  0xd1   :  { %v155_v22 = vadd.f32 %v305_v19, %v142_v18 }
  0xd2   :  { %v144_v21 = vpop.f32.mrf.mxu1 }
  0xd3   :  { %v145_v23 = vadd.f32 %v144_v21, %v82_v15  ;;  %v157_v26 = vmax.f32 %v155_v22, 0.0 }
  0xd4   :  { %v337_v24 = vpop.f32.mrf.mxu1 }
  0xd5   :  { %v156_v25 = vadd.f32 %v305_v19, %v145_v23 }
  0xd7   :  { %v158_v27 = vmax.f32 %v156_v25, 0.0 }
  0xd9   :  { %v159_v28 = vpack.c.bf16 %v158_v27, %v157_v26 }
  0xdb   :  { %347 = vmatmul.mubr.msk.bf16.vlgmr.msra.gmra.mxu0 %vm199_vm4, %v159_v28 }
 0x19b   :  { %v237_v30 = vpop.f32.mrf.mxu0 }
 0x19c   :  { %v238_v31 = vadd.f32 %v306_v29, %v237_v30 }
 0x19d   :  { %v348_v32 = vpop.f32.mrf.mxu0 }
 0x19e   :  { %v312_v33 = vmul.f32 -1.442695, %v238_v31 }
 0x19f   :  { %v240_v34 = vpop.f32.mrf.mxu0 }
 0x1a0   :  { %359 = vpow2.f32 %v312_v33  ;;  %v241_v35 = vadd.f32 %v306_v29, %v240_v34 }
 0x1a1   :  { %v349_v36 = vpop.f32.mrf.mxu0 }
 0x1a2   :  { %v313_v37 = vmul.f32 -1.442695, %v241_v35 }
 0x1a4   :  { %361 = vpow2.f32 %v313_v37 }
 0x1ad   :  { %v360_v38 = vpop.eup %359 }
 0x1ae   :  { %v250_v39 = vadd.f32 1.0, %v360_v38 }
 0x1b0   :  { %363 = vrcp.f32 %v250_v39 }
 0x1b1   :  { %v362_v40 = vpop.eup %361 }
 0x1b2   :  { %v251_v41 = vadd.f32 1.0, %v362_v40 }
 0x1b4   :  { %365 = vrcp.f32 %v251_v41 }
 0x1bd   :  { %v364_v42 = vpop.eup %363 }
 0x1be   :  { %257 = vst.msk [vmem:[#allocation2] sm:$0xff] %vm256_vm5, %v364_v42 }
 0x1c1   :  { %v366_v43 = vpop.eup %365 }
 0x1c5   :  { %v289_v44 = vld [vmem:[#allocation2] sm:$0xff] }
 0x1c6   :  { %290 = vst [vmem:[%s455_s7] sm:$0xff] %v289_v44 }

</bundles_post_ra>
